<compile_context>
chip_gen: v5e
topology: v5e:2x2
jax: 0.10.0
libtpu: 0.0.40
codegen_flags: <defaults>
</compile_context>

<pallas_src>
import jax
import jax.numpy as jnp
from jax.experimental import pallas as pl
from jax.experimental.pallas import tpu as pltpu

HIDDEN = 128            # fc1/fc2 width from the PyTorch module
TM = 512                # batch tile for the gridded path (8-sublane multiple)
GRID_THRESHOLD = 1024   # below this batch size a single block is cheaper


def qnet_kernel(x_ref, w1_ref, b1_ref, w2_ref, b2_ref, w3_ref, b3_ref, out_ref):
    # fc1 + ReLU (MXU matmul, f32 accumulation; bias broadcast from (1, 128))
    h = jnp.dot(x_ref[...], w1_ref[...], preferred_element_type=jnp.float32)
    h = jnp.maximum(h + b1_ref[...], 0.0)
    # fc2 + ReLU
    h = jnp.dot(h, w2_ref[...], preferred_element_type=jnp.float32)
    h = jnp.maximum(h + b2_ref[...], 0.0)
    # fc3 -> natural (tile, actions) output (no lane padding; see header note)
    h = jnp.dot(h, w3_ref[...], preferred_element_type=jnp.float32)
    out_ref[...] = (h + b3_ref[...]).astype(out_ref.dtype)


def _cost_estimate(batch, num_input, actions):
    flops = 2 * batch * (num_input * HIDDEN + HIDDEN * HIDDEN + HIDDEN * actions)
    bytes_accessed = 4 * (
        batch * num_input + batch * actions                        # x, out
        + num_input * HIDDEN + HIDDEN * HIDDEN + HIDDEN * actions  # weights
        + HIDDEN + HIDDEN + actions                                # biases
    )
    return pl.CostEstimate(flops=flops, transcendentals=0,
                           bytes_accessed=bytes_accessed)


def qnet_forward(x, params):
    """x: (B, num_input) float32 -> (B, actions) float32."""
    w1, b1, w2, b2, w3, b3 = params
    batch, num_input = x.shape
    actions = w3.shape[1]
    cost = _cost_estimate(batch, num_input, actions)

    if batch <= GRID_THRESHOLD:
        # Single-block path: everything VMEM-resident, no grid-step overhead.
        # Block shapes equal the full array dims, so the (8,128) rule is met
        # even for tiny batches / narrow feature dims.
        vmem = pl.BlockSpec(memory_space=pltpu.MemorySpace.VMEM)
        return pl.pallas_call(
            qnet_kernel,
            out_shape=jax.ShapeDtypeStruct((batch, actions), jnp.float32),
            in_specs=[vmem] * 7,
            out_specs=vmem,
            cost_estimate=cost,
        )(x, w1, b1, w2, b2, w3, b3)

    # Batch-tiled path: 1-D grid over batch; weights/biases stay VMEM-resident
    # (same block every step), x/out tiles are pipelined against compute.
    n_tiles = pl.cdiv(batch, TM)
    padded_batch = n_tiles * TM
    if padded_batch != batch:
        x_in = jnp.zeros((padded_batch, num_input), x.dtype).at[:batch].set(x)
    else:
        x_in = x

    def resident(arr):
        # Full-array block, same block index every grid step -> stays in VMEM.
        return pl.BlockSpec(arr.shape, lambda i: (0, 0))

    out = pl.pallas_call(
        qnet_kernel,
        out_shape=jax.ShapeDtypeStruct((padded_batch, actions), jnp.float32),
        grid=(n_tiles,),
        in_specs=[
            pl.BlockSpec((TM, num_input), lambda i: (i, 0)),   # x tile
            resident(w1), resident(b1),
            resident(w2), resident(b2),
            resident(w3), resident(b3),
        ],
        out_specs=pl.BlockSpec((TM, actions), lambda i: (i, 0)),
        compiler_params=pltpu.CompilerParams(
            dimension_semantics=("parallel",)),  # shards across v7x's 2 TCs
        cost_estimate=cost,
    )(x_in, w1, b1, w2, b2, w3, b3)

    return out[:batch] if padded_batch != batch else out


def init_qnet_params(key, num_input, actions, hidden=HIDDEN):
    """Deterministic PyTorch-style (Kaiming-uniform-ish) Linear init.

    Weights are stored as (in_features, out_features); biases as (1, out).
    """
    def linear_init(k, fan_in, fan_out):
        kw, kb = jax.random.split(k)
        bound = 1.0 / jnp.sqrt(float(fan_in))
        w = jax.random.uniform(kw, (fan_in, fan_out), jnp.float32, -bound, bound)
        b = jax.random.uniform(kb, (1, fan_out), jnp.float32, -bound, bound)
        return w, b

    k1, k2, k3 = jax.random.split(key, 3)
    w1, b1 = linear_init(k1, num_input, hidden)
    w2, b2 = linear_init(k2, hidden, hidden)
    w3, b3 = linear_init(k3, hidden, actions)
    return (w1, b1, w2, b2, w3, b3)


def qnet_reference(x, params):
    """Pure-JAX reference of the same forward pass."""
    w1, b1, w2, b2, w3, b3 = params
    h = jnp.maximum(x @ w1 + b1, 0.0)
    h = jnp.maximum(h @ w2 + b2, 0.0)
    return h @ w3 + b3


if __name__ == "__main__":
    # Small shapes consistent with a DQN observation vector (CartPole-like).
    num_input = 8
    actions = 4

    key = jax.random.PRNGKey(0)
    kx1, kx2, kp = jax.random.split(key, 3)
    params = init_qnet_params(kp, num_input, actions)

    # 1) Small-batch (single-block) path — the typical sample_action call.
    x_small = jax.random.normal(kx1, (2, num_input), dtype=jnp.float32)
    out_small = jax.block_until_ready(qnet_forward(x_small, params))
    ref_small = qnet_reference(x_small, params)
    assert out_small.shape == (2, actions)
    assert jnp.allclose(out_small, ref_small, atol=1e-5, rtol=1e-5), \
        "small-batch mismatch vs JAX reference"

    # 2) Batch-tiled (gridded) path with an uneven batch to exercise padding.
    large_batch = GRID_THRESHOLD + 300
    x_large = jax.random.normal(kx2, (large_batch, num_input), dtype=jnp.float32)
    out_large = jax.block_until_ready(qnet_forward(x_large, params))
    ref_large = qnet_reference(x_large, params)
    assert out_large.shape == (large_batch, actions)
    assert jnp.allclose(out_large, ref_large, atol=1e-5, rtol=1e-5), \
        "tiled-batch mismatch vs JAX reference"

    print("KERNEL_OK")
</pallas_src>

<mosaic_0001>
module attributes {stable_mosaic.version = 11 : i64} {
  func.func @qnet_kernel(%arg0: memref<2x8xf32, #tpu.memory_space<vmem>>, %arg1: memref<8x128xf32, #tpu.memory_space<vmem>>, %arg2: memref<1x128xf32, #tpu.memory_space<vmem>>, %arg3: memref<128x128xf32, #tpu.memory_space<vmem>>, %arg4: memref<1x128xf32, #tpu.memory_space<vmem>>, %arg5: memref<128x4xf32, #tpu.memory_space<vmem>>, %arg6: memref<1x4xf32, #tpu.memory_space<vmem>>, %arg7: memref<2x4xf32, #tpu.memory_space<vmem>>) attributes {dimension_semantics = [], scalar_prefetch = 0 : i64, scratch_operands = 0 : i64, tpu.core_type = #tpu.core_type<tc>} {
    %c0 = arith.constant 0 : index
    %c0_0 = arith.constant 0 : index
    %0 = vector.load %arg0[%c0, %c0_0] : memref<2x8xf32, #tpu.memory_space<vmem>>, vector<2x8xf32>
    %c0_1 = arith.constant 0 : index
    %c0_2 = arith.constant 0 : index
    %1 = vector.load %arg1[%c0_1, %c0_2] : memref<8x128xf32, #tpu.memory_space<vmem>>, vector<8x128xf32>
    %cst = arith.constant dense<0.000000e+00> : vector<2x128xf32>
    %2 = tpu.matmul %0, %1, %cst {dimension_numbers = #tpu.dot_dimension_numbers<[1], [0], [0], [1], [0, 0, 1, 1], [], []>} : vector<2x8xf32>, vector<8x128xf32>, vector<2x128xf32> -> vector<2x128xf32>
    %c0_3 = arith.constant 0 : index
    %c0_4 = arith.constant 0 : index
    %3 = vector.load %arg2[%c0_3, %c0_4] : memref<1x128xf32, #tpu.memory_space<vmem>>, vector<1x128xf32>
    %4 = vector.broadcast %3 : vector<1x128xf32> to vector<2x128xf32>
    %5 = arith.addf %2, %4 : vector<2x128xf32>
    %cst_5 = arith.constant 0.000000e+00 : f32
    %6 = vector.broadcast %cst_5 : f32 to vector<2x128xf32>
    %7 = arith.maximumf %5, %6 : vector<2x128xf32>
    %c0_6 = arith.constant 0 : index
    %c0_7 = arith.constant 0 : index
    %8 = vector.load %arg3[%c0_6, %c0_7] : memref<128x128xf32, #tpu.memory_space<vmem>>, vector<128x128xf32>
    %cst_8 = arith.constant dense<0.000000e+00> : vector<2x128xf32>
    %9 = tpu.matmul %7, %8, %cst_8 {dimension_numbers = #tpu.dot_dimension_numbers<[1], [0], [0], [1], [0, 0, 1, 1], [], []>} : vector<2x128xf32>, vector<128x128xf32>, vector<2x128xf32> -> vector<2x128xf32>
    %c0_9 = arith.constant 0 : index
    %c0_10 = arith.constant 0 : index
    %10 = vector.load %arg4[%c0_9, %c0_10] : memref<1x128xf32, #tpu.memory_space<vmem>>, vector<1x128xf32>
    %11 = vector.broadcast %10 : vector<1x128xf32> to vector<2x128xf32>
    %12 = arith.addf %9, %11 : vector<2x128xf32>
    %cst_11 = arith.constant 0.000000e+00 : f32
    %13 = vector.broadcast %cst_11 : f32 to vector<2x128xf32>
    %14 = arith.maximumf %12, %13 : vector<2x128xf32>
    %c0_12 = arith.constant 0 : index
    %c0_13 = arith.constant 0 : index
    %15 = vector.load %arg5[%c0_12, %c0_13] : memref<128x4xf32, #tpu.memory_space<vmem>>, vector<128x4xf32>
    %cst_14 = arith.constant dense<0.000000e+00> : vector<2x4xf32>
    %16 = tpu.matmul %14, %15, %cst_14 {dimension_numbers = #tpu.dot_dimension_numbers<[1], [0], [0], [1], [0, 0, 1, 1], [], []>} : vector<2x128xf32>, vector<128x4xf32>, vector<2x4xf32> -> vector<2x4xf32>
    %c0_15 = arith.constant 0 : index
    %c0_16 = arith.constant 0 : index
    %17 = vector.load %arg6[%c0_15, %c0_16] : memref<1x4xf32, #tpu.memory_space<vmem>>, vector<1x4xf32>
    %18 = vector.broadcast %17 : vector<1x4xf32> to vector<2x4xf32>
    %19 = arith.addf %16, %18 : vector<2x4xf32>
    %c0_17 = arith.constant 0 : index
    %c0_18 = arith.constant 0 : index
    %20 = vector.load %arg7[%c0_17, %c0_18] : memref<2x4xf32, #tpu.memory_space<vmem>>, vector<2x4xf32>
    tpu.vector_store %arg7[%c0_17, %c0_18], %19 {strides = array<i32>} : memref<2x4xf32, #tpu.memory_space<vmem>>, vector<2x4xf32>,
    return
  }
}

</mosaic_0001>

<bundles_post_ra>
// kernel: tpu_custom_call.1
= control target key start
LH: loop header
LB: loop body
LE: loop exit
PB: predicated region body
PF: predicated region fallthrough
CT: control target
= control target key end

     0   :  { %12 = vsyncpa [#allocation3], 0  ;;  %s386_s0 = inlined_call_operand.vmem [shape: f32[2,8], index: 0, kind: input, shape index: {}]   ;;  %s387_s1 = inlined_call_operand.hbm [shape: f32[8,128], index: 1, kind: input, shape index: {}]   ;;  %s388_s2 = inlined_call_operand.vmem [shape: f32[1,128], index: 2, kind: input, shape index: {}]   ;;  %s389_s3 = inlined_call_operand.vmem [shape: f32[128,128], index: 3, kind: input, shape index: {}]   ;;  %s390_s4 = inlined_call_operand.vmem [shape: f32[1,128], index: 4, kind: input, shape index: {}]   ;;  %s391_s5 = inlined_call_operand.vmem [shape: f32[128,4], index: 5, kind: input, shape index: {}]   ;;  %s392_s6 = inlined_call_operand.vmem [shape: f32[1,4], index: 6, kind: input, shape index: {}]   ;;  %s393_s7 = inlined_call_operand.hbm [shape: f32[2,4], index: 7, kind: output, shape index: {}]  }
   0x1   :  { %13 = vsyncpa [#allocation4], 0  ;;  %s21_s26 = sshll.u32 %s387_s1, 4  ;;  %s230_s27 = smov [#allocation2]   ;;  %s22_s26 = int_to_ptr.hbm [resolvable:$true] %s21_s26 }
   0x2   :  { %s23_s28 = sshll.u32 %s230_s27, 4  ;;  %s24_s28 = int_to_ptr.vmem [resolvable:$true] %s23_s28 }
   0x3   :  { %26 = dma.hbm_to_vmem [thread:$0]  %s22_s26, 128, %s24_s28, [#allocation3]  }
   0x4   :  { %226 = dma.done.wait [#allocation3], 128  }
   0x5   :  { %227 = vsyncadd [#allocation3], 4294967168  ;;  %vm47_vm0 = vcmask 64512   ;;  %v42_v0 = vld [vmem:[#allocation2] sm:$0xff]  ;;  %v87_v2 = vld [vmem:[%s389_s3 + $0x78] sm:$0xff]  ;;  %s231_s23 = smov [#allocation5]  }
   0x6   :  { %v41_v1 = vld [vmem:[%s386_s0] sm:$0x3]  ;;  %66 = vmatpush.msra.mxu0 %v42_v0  ;;  %92 = vmatpush.msra.mxu1 %v87_v2  ;;  %v86_v3 = vld [vmem:[%s389_s3 + $0x70] sm:$0xff]  ;;  %v85_v4 = vld [vmem:[%s389_s3 + $0x68] sm:$0xff]  ;;  %s160_s24 = sshll.u32 %s231_s23, 4  ;;  %s162_s27 = sshll.u32 %s393_s7, 4  ;;  %s161_s24 = int_to_ptr.vmem [resolvable:$true] %s160_s24  ;;  %s163_s27 = int_to_ptr.hbm [resolvable:$true] %s162_s27 }
   0x7   :  { %172 = vmatmul.msk.f32.vlgmr.msra.gmra.mxu0 %vm47_vm0, %v41_v1  ;;  %v84_v5 = vld [vmem:[%s389_s3 + $0x60] sm:$0xff]  ;;  %v83_v6 = vld [vmem:[%s389_s3 + $0x58] sm:$0xff]  ;;  %v82_v7 = vld [vmem:[%s389_s3 + $0x50] sm:$0xff]  ;;  %vm153_vm1 = vcmask 25600  }
   0x8   :  { %93 = vmatpush.msra.mxu1 %v86_v3  ;;  %v81_v8 = vld [vmem:[%s389_s3 + $0x48] sm:$0xff]  ;;  %v80_v9 = vld [vmem:[%s389_s3 + $0x40] sm:$0xff]  ;;  %v79_v10 = vld [vmem:[%s389_s3 + $0x38] sm:$0xff] }
   0x9   :  { %v78_v11 = vld [vmem:[%s389_s3 + $0x30] sm:$0xff]  ;;  %v77_v12 = vld [vmem:[%s389_s3 + $0x28] sm:$0xff]  ;;  %v76_v13 = vld [vmem:[%s389_s3 + $0x20] sm:$0xff] }
   0xa   :  { %94 = vmatpush.msra.mxu1 %v85_v4  ;;  %v75_v14 = vld [vmem:[%s389_s3 + $0x18] sm:$0xff]  ;;  %v74_v15 = vld [vmem:[%s389_s3 + $0x10] sm:$0xff]  ;;  %v73_v16 = vld [vmem:[%s389_s3 + $0x8] sm:$0xff] }
   0xb   :  { %v72_v17 = vld [vmem:[%s389_s3] sm:$0xff]  ;;  %v128_v18 = vld [vmem:[%s391_s5 + $0x78] sm:$0xff]  ;;  %v127_v19 = vld [vmem:[%s391_s5 + $0x70] sm:$0xff] }
   0xc   :  { %95 = vmatpush.msra.mxu1 %v84_v5  ;;  %133 = vmatpush.msra.mxu2 %v128_v18  ;;  %v126_v20 = vld [vmem:[%s391_s5 + $0x68] sm:$0xff]  ;;  %v125_v21 = vld [vmem:[%s391_s5 + $0x60] sm:$0xff]  ;;  %v124_v22 = vld [vmem:[%s391_s5 + $0x58] sm:$0xff] }
   0xd   :  { %v123_v23 = vld [vmem:[%s391_s5 + $0x50] sm:$0xff]  ;;  %v122_v24 = vld [vmem:[%s391_s5 + $0x48] sm:$0xff]  ;;  %v121_v25 = vld [vmem:[%s391_s5 + $0x40] sm:$0xff] }
   0xe   :  { %96 = vmatpush.msra.mxu1 %v83_v6  ;;  %134 = vmatpush.msra.mxu2 %v127_v19  ;;  %v120_v26 = vld [vmem:[%s391_s5 + $0x38] sm:$0xff]  ;;  %v119_v27 = vld [vmem:[%s391_s5 + $0x30] sm:$0xff]  ;;  %v118_v28 = vld [vmem:[%s391_s5 + $0x28] sm:$0xff] }
   0xf   :  { %v117_v29 = vld [vmem:[%s391_s5 + $0x20] sm:$0xff]  ;;  %v116_v30 = vld [vmem:[%s391_s5 + $0x18] sm:$0xff]  ;;  %v115_v35 = vld [vmem:[%s391_s5 + $0x10] sm:$0xff] }
  0x10   :  { %97 = vmatpush.msra.mxu1 %v82_v7  ;;  %135 = vmatpush.msra.mxu2 %v126_v20  ;;  %v175_v31 = vld [vmem:[%s388_s2] ss:$0 sm:$0xff]  ;;  %v114_v36 = vld [vmem:[%s391_s5 + $0x8] sm:$0xff] }
  0x11   :  { %v113_v37 = vld [vmem:[%s391_s5] sm:$0xff] }
  0x12   :  { %98 = vmatpush.msra.mxu1 %v81_v8  ;;  %136 = vmatpush.msra.mxu2 %v125_v21  ;;  %v176_v38 = vld [vmem:[%s390_s4] ss:$0 sm:$0xff] }
  0x13   :  { %v177_v42 = vld [vmem:[%s392_s6] ss:$0 sm:$0xff] }
  0x14   :  { %99 = vmatpush.msra.mxu1 %v80_v9  ;;  %137 = vmatpush.msra.mxu2 %v124_v22 }
  0x16   :  { %100 = vmatpush.msra.mxu1 %v79_v10  ;;  %138 = vmatpush.msra.mxu2 %v123_v23 }
  0x18   :  { %101 = vmatpush.msra.mxu1 %v78_v11  ;;  %139 = vmatpush.msra.mxu2 %v122_v24 }
  0x1a   :  { %102 = vmatpush.msra.mxu1 %v77_v12  ;;  %140 = vmatpush.msra.mxu2 %v121_v25 }
  0x1c   :  { %103 = vmatpush.msra.mxu1 %v76_v13  ;;  %141 = vmatpush.msra.mxu2 %v120_v26 }
  0x1e   :  { %104 = vmatpush.msra.mxu1 %v75_v14  ;;  %142 = vmatpush.msra.mxu2 %v119_v27 }
  0x20   :  { %105 = vmatpush.msra.mxu1 %v74_v15  ;;  %143 = vmatpush.msra.mxu2 %v118_v28 }
  0x22   :  { %106 = vmatpush.msra.mxu1 %v73_v16  ;;  %144 = vmatpush.msra.mxu2 %v117_v29 }
  0x24   :  { %107 = vmatpush.msra.mxu1 %v72_v17  ;;  %145 = vmatpush.msra.mxu2 %v116_v30 }
  0x26   :  { %146 = vmatpush.msra.mxu2 %v115_v35 }
  0x28   :  { %147 = vmatpush.msra.mxu2 %v114_v36 }
  0x2a   :  { %148 = vmatpush.msra.mxu2 %v113_v37 }
  0x84   :  { %v68_v32 = vpop.f32.mrf.mxu0 }
  0x85   :  { %v69_v33 = vadd.f32 %v175_v31, %v68_v32 }
  0x87   :  { %v71_v34 = vmax.f32 %v69_v33, 0.0 }
  0x89   :  { %108 = vmatmul.f32.vlgmr.msra.gmra.mxu1 %v71_v34 }
 0x106   :  { %v109_v39 = vpop.f32.mrf.mxu1 }
 0x107   :  { %v110_v40 = vadd.f32 %v176_v38, %v109_v39 }
 0x109   :  { %v112_v41 = vmax.f32 %v110_v40, 0.0 }
 0x10b   :  { %149 = vmatmul.f32.vlgmr.msra.gmra.mxu2 %v112_v41 }
 0x18e   :  { %v150_v43 = vpop.f32.mrf.mxu2 }
 0x18f   :  { %v151_v44 = vadd.f32 %v177_v42, %v150_v43 }
 0x191   :  { %154 = vst.msk [vmem:[#allocation5] sm:$0x3] %vm153_vm1, %v151_v44 }
 0x192   :  { %165 = dma.vmem_to_hbm [thread:$0]  %s161_s24, 32, %s163_s27, [#allocation4]  }
 0x193   :  { %228 = dma.done.wait [#allocation4], 32  }
 0x194   :  { %229 = vsyncadd [#allocation4], 4294967264 }
 0x195   :  { %170 = vsyncpa [#allocation3], 1 }
 0x196   :  { %171 = vsyncpa [#allocation4], 1 }

</bundles_post_ra>
